<compile_context>
chip_gen: v7x
topology: tpu7x:2x2x1
jax: 0.10.0
libtpu: 0.0.40
codegen_flags: <defaults>
</compile_context>

<pallas_src>
import functools

import jax
import jax.numpy as jnp
from jax.experimental import pallas as pl
from jax.experimental.pallas import tpu as pltpu

_LANES = 128


def _sparse_dropout_kernel(seed_ref, vals_ref, out_vals_ref, mask_ref, *,
                           keep_threshold, inv_kprob, tile_rows):
    """Dropout on one (tile_rows, 128) tile of the padded value buffer."""
    i = pl.program_id(0)
    shape = vals_ref.shape

    # Global element index of every lane in this tile (counter for the hash).
    row = jax.lax.broadcasted_iota(jnp.int32, shape, 0).astype(jnp.uint32)
    col = jax.lax.broadcasted_iota(jnp.int32, shape, 1).astype(jnp.uint32)
    base_row = (i * tile_rows).astype(jnp.uint32)
    idx = (base_row + row) * jnp.uint32(_LANES) + col

    # Counter-based RNG: mix seed, then lowbias32 hash -> uniform uint32 bits.
    seed_u = seed_ref[0].astype(jnp.uint32)
    x = idx ^ (seed_u * jnp.uint32(0x9E3779B9))
    x = (x ^ (x >> 16)) * jnp.uint32(0x7FEB352D)
    x = (x ^ (x >> 15)) * jnp.uint32(0x846CA68B)
    x = x ^ (x >> 16)

    # keep with probability kprob  (integer compare, no float conversion).
    keep = x < jnp.uint32(keep_threshold)

    out_vals_ref[...] = jnp.where(keep, vals_ref[...] * inv_kprob, 0.0)
    mask_ref[...] = keep.astype(jnp.int8)


def sparse_dropout(indices, values, num_ids, num_items, *, dprob=0.5, seed=0):
    """Pallas SparseDropout.

    Returns (rc, val, nkept, shape):
      rc    : int32 (2, nnz)  indices, kept entries stably compacted to front
      val   : float32 (nnz,)  scaled kept values; zeros past nkept
      nkept : int32 scalar    number of surviving nonzeros
      shape : (num_ids, num_items)
    """
    kprob = 1.0 - float(dprob)
    nnz = int(values.shape[0])

    # int8 mask output wants the sublane dim to be a multiple of 32, so pad the
    # nonzeros to a multiple of 32 * 128 = 4096 elements.
    elems_per_block = 32 * _LANES
    nnz_pad = max(
        elems_per_block,
        ((nnz + elems_per_block - 1) // elems_per_block) * elems_per_block,
    )
    rows = nnz_pad // _LANES

    # Tile the rows so HBM<->VMEM DMA overlaps the VPU work; ~1 MiB f32 per
    # array per tile, a few MiB total with double buffering (fits v7x too).
    tile_rows = min(rows, 2048)
    if rows % tile_rows:
        rows = ((rows + tile_rows - 1) // tile_rows) * tile_rows
        nnz_pad = rows * _LANES
    grid = (rows // tile_rows,)

    vals2d = (
        jnp.zeros((nnz_pad,), jnp.float32)
        .at[:nnz]
        .set(values.astype(jnp.float32))
        .reshape(rows, _LANES)
    )
    seed_arr = jnp.asarray([seed], dtype=jnp.int32)

    if kprob <= 0.0:
        keep_threshold = 0       # drop everything
        inv_kprob = 0.0
    else:
        keep_threshold = min(int(round(kprob * 2.0 ** 32)), 2 ** 32 - 1)
        inv_kprob = 1.0 / kprob

    kernel = functools.partial(
        _sparse_dropout_kernel,
        keep_threshold=keep_threshold,
        inv_kprob=inv_kprob,
        tile_rows=tile_rows,
    )

    out_vals2d, mask2d = pl.pallas_call(
        kernel,
        out_shape=[
            jax.ShapeDtypeStruct((rows, _LANES), jnp.float32),
            jax.ShapeDtypeStruct((rows, _LANES), jnp.int8),
        ],
        grid_spec=pltpu.PrefetchScalarGridSpec(
            num_scalar_prefetch=1,
            grid=grid,
            in_specs=[pl.BlockSpec((tile_rows, _LANES), lambda i, s: (i, 0))],
            out_specs=[
                pl.BlockSpec((tile_rows, _LANES), lambda i, s: (i, 0)),
                pl.BlockSpec((tile_rows, _LANES), lambda i, s: (i, 0)),
            ],
        ),
        compiler_params=pltpu.CompilerParams(
            dimension_semantics=("parallel",),
        ),
    )(seed_arr, vals2d)

    out_vals = out_vals2d.reshape(-1)[:nnz]
    keep = mask2d.reshape(-1)[:nnz] > 0

    # Stable O(nnz) compaction (cumsum + scatter; no argsort).
    # TODO(synk): PyTorch returns a dynamically-sized sparse tensor; JAX needs
    # static shapes, so kept entries are compacted to the front, dropped slots
    # carry index (0,0) with value 0, and nkept reports the surviving count.
    keep_i = keep.astype(jnp.int32)
    nkept = jnp.sum(keep_i)
    pos = jnp.cumsum(keep_i) - 1
    tgt = jnp.where(keep, pos, nnz)  # dropped entries scatter out of bounds
    rc = jnp.zeros((2, nnz), indices.dtype).at[:, tgt].set(indices, mode="drop")
    val = jnp.zeros((nnz,), out_vals.dtype).at[tgt].set(out_vals, mode="drop")
    return rc, val, nkept, (num_ids, num_items)


if __name__ == "__main__":
    key = jax.random.PRNGKey(0)
    k_row, k_col, k_val = jax.random.split(key, 3)

    num_ids, num_items, nnz = 16, 16, 32
    rows_idx = jax.random.randint(k_row, (nnz,), 0, num_ids, dtype=jnp.int32)
    cols_idx = jax.random.randint(k_col, (nnz,), 0, num_items, dtype=jnp.int32)
    indices = jnp.stack([rows_idx, cols_idx], axis=0)          # (2, nnz)
    values = jax.random.normal(k_val, (nnz,), dtype=jnp.float32)

    rc, val, nkept, shape = sparse_dropout(
        indices, values, num_ids, num_items, dprob=0.5, seed=1234
    )
    jax.block_until_ready((rc, val, nkept))

    # sanity: shapes, count bounds, dropped tail is zero, kept values = 2x orig
    assert rc.shape == (2, nnz) and val.shape == (nnz,)
    n = int(nkept)
    assert 0 <= n <= nnz
    assert bool(jnp.all(val[n:] == 0.0))
    if n > 0:
        ratios = val[:n] / 2.0  # 1/kprob = 2.0; each kept value must match an original
        assert bool(jnp.all(jnp.min(jnp.abs(ratios[:, None] - values[None, :]), axis=1) < 1e-5))
    print("KERNEL_OK")
</pallas_src>

<mosaic_0001>
module attributes {stable_mosaic.version = 11 : i64} {
  func.func @_sparse_dropout_kernel(%arg0: i32, %arg1: memref<1xi32, #tpu.memory_space<smem>>, %arg2: memref<32x128xf32, #tpu.memory_space<vmem>>, %arg3: memref<32x128xf32, #tpu.memory_space<vmem>>, %arg4: memref<32x128xi8, #tpu.memory_space<vmem>>) attributes {dimension_semantics = [#tpu.dimension_semantics<parallel>], iteration_bounds = array<i64: 1>, scalar_prefetch = 1 : i64, scratch_operands = 0 : i64, tpu.core_type = #tpu.core_type<tc>, window_params = [{transform_indices = @transform_0, window_bounds = array<i64: 32, 128>}, {transform_indices = @transform_1, window_bounds = array<i64: 32, 128>}, {transform_indices = @transform_2, window_bounds = array<i64: 32, 128>}]} {
    %0 = tpu.iota {dimensions = array<i32: 0>} : vector<32x128xi32>
    %1 = tpu.iota {dimensions = array<i32: 1>} : vector<32x128xi32>
    %c32_i32 = arith.constant 32 : i32
    %2 = arith.muli %arg0, %c32_i32 : i32
    %3 = vector.broadcast %2 : i32 to vector<32x128xi32>
    %4 = arith.addi %3, %0 : vector<32x128xi32>
    %c128_i32 = arith.constant 128 : i32
    %5 = vector.broadcast %c128_i32 : i32 to vector<32x128xi32>
    %6 = arith.muli %4, %5 : vector<32x128xi32>
    %7 = arith.addi %6, %1 : vector<32x128xi32>
    %c0 = arith.constant 0 : index
    %8 = memref.load %arg1[%c0] : memref<1xi32, #tpu.memory_space<smem>>
    %c-1640531527_i32 = arith.constant -1640531527 : i32
    %9 = arith.muli %8, %c-1640531527_i32 : i32
    %10 = vector.broadcast %9 : i32 to vector<32x128xi32>
    %11 = arith.xori %7, %10 : vector<32x128xi32>
    %c16_i32 = arith.constant 16 : i32
    %12 = vector.broadcast %c16_i32 : i32 to vector<32x128xi32>
    %13 = arith.shrui %11, %12 : vector<32x128xi32>
    %14 = arith.xori %11, %13 : vector<32x128xi32>
    %c2146121005_i32 = arith.constant 2146121005 : i32
    %15 = vector.broadcast %c2146121005_i32 : i32 to vector<32x128xi32>
    %16 = arith.muli %14, %15 : vector<32x128xi32>
    %c15_i32 = arith.constant 15 : i32
    %17 = vector.broadcast %c15_i32 : i32 to vector<32x128xi32>
    %18 = arith.shrui %16, %17 : vector<32x128xi32>
    %19 = arith.xori %16, %18 : vector<32x128xi32>
    %c-2073254261_i32 = arith.constant -2073254261 : i32
    %20 = vector.broadcast %c-2073254261_i32 : i32 to vector<32x128xi32>
    %21 = arith.muli %19, %20 : vector<32x128xi32>
    %c16_i32_0 = arith.constant 16 : i32
    %22 = vector.broadcast %c16_i32_0 : i32 to vector<32x128xi32>
    %23 = arith.shrui %21, %22 : vector<32x128xi32>
    %24 = arith.xori %21, %23 : vector<32x128xi32>
    %c-2147483648_i32 = arith.constant -2147483648 : i32
    %25 = vector.broadcast %c-2147483648_i32 : i32 to vector<32x128xi32>
    %26 = arith.cmpi ult, %24, %25 : vector<32x128xi32>
    %c0_1 = arith.constant 0 : index
    %c0_2 = arith.constant 0 : index
    %27 = vector.load %arg2[%c0_1, %c0_2] : memref<32x128xf32, #tpu.memory_space<vmem>>, vector<32x128xf32>
    %cst = arith.constant 2.000000e+00 : f32
    %28 = vector.broadcast %cst : f32 to vector<32x128xf32>
    %29 = arith.mulf %27, %28 : vector<32x128xf32>
    %cst_3 = arith.constant 0.000000e+00 : f32
    %30 = vector.broadcast %cst_3 : f32 to vector<32x128xf32>
    %31 = arith.select %26, %29, %30 : vector<32x128xi1>, vector<32x128xf32>
    %c0_4 = arith.constant 0 : index
    %c0_5 = arith.constant 0 : index
    %32 = vector.load %arg3[%c0_4, %c0_5] : memref<32x128xf32, #tpu.memory_space<vmem>>, vector<32x128xf32>
    tpu.vector_store %arg3[%c0_4, %c0_5], %31 {strides = array<i32>} : memref<32x128xf32, #tpu.memory_space<vmem>>, vector<32x128xf32>,
    %33 = arith.extui %26 : vector<32x128xi1> to vector<32x128xi8>
    %c0_6 = arith.constant 0 : index
    %c0_7 = arith.constant 0 : index
    %34 = vector.load %arg4[%c0_6, %c0_7] : memref<32x128xi8, #tpu.memory_space<vmem>>, vector<32x128xi8>
    tpu.vector_store %arg4[%c0_6, %c0_7], %33 {strides = array<i32>} : memref<32x128xi8, #tpu.memory_space<vmem>>, vector<32x128xi8>,
    return
  }
  func.func @transform_0(%arg0: i32, %arg1: memref<1xi32, #tpu.memory_space<smem>>) -> (i32, i32) {
    %c0_i32 = arith.constant 0 : i32
    %c0_i32_0 = arith.constant 0 : i32
    return %arg0, %c0_i32 : i32, i32
  }
  func.func @transform_1(%arg0: i32, %arg1: memref<1xi32, #tpu.memory_space<smem>>) -> (i32, i32) {
    %c0_i32 = arith.constant 0 : i32
    %c0_i32_0 = arith.constant 0 : i32
    return %arg0, %c0_i32 : i32, i32
  }
  func.func @transform_2(%arg0: i32, %arg1: memref<1xi32, #tpu.memory_space<smem>>) -> (i32, i32) {
    %c0_i32 = arith.constant 0 : i32
    %c0_i32_0 = arith.constant 0 : i32
    return %arg0, %c0_i32 : i32, i32
  }
}

</mosaic_0001>

<bundles_post_ra>
// kernel: tpu_custom_call.1
= control target key start
LH: loop header
LB: loop body
LE: loop exit
PB: predicated region body
PF: predicated region fallthrough
CT: control target
= control target key end

     0   :  { %10 = vsyncpa [#allocation5], 0  ;;  %s304_s0 = inlined_call_operand.<no memory space> [shape: s32[1], index: 0, kind: input, shape index: {}]   ;;  %s305_s1 = inlined_call_operand.hbm [shape: f32[32,128], index: 1, kind: input, shape index: {}]   ;;  %s306_s2 = inlined_call_operand.hbm [shape: f32[32,128], index: 2, kind: output, shape index: {0}]   ;;  %s307_s3 = inlined_call_operand.hbm [shape: s8[32,128], index: 3, kind: output, shape index: {1}]  }
   0x1   :  { %11 = vsyncpa [#allocation6], 0 }
   0x2   :  { %12 = vsyncpa [#allocation9], 0  ;;  %s224_s12 = smov [#allocation4]   ;;  %s152_s16 = scalar_lea.hbm %s305_s1, 512 }
   0x3   :  { %s18_s13 = sshll.u32 %s224_s12, 4  ;;  %p153_p0 = scmp.ne.s32.totalorder %s305_s1, %s152_s16  ;;  %s19_s13 = int_to_ptr.vmem [resolvable:$true] %s18_s13 }
   0x4   :  { %p156_p1 = scmp.lt.u32.totalorder %s152_s16, %s305_s1 }
   0x6   :  { %p158_p2 = pnand %p156_p1, %p153_p0 }
   0x8   :  { %161 = shalt.err (!%p158_p2)
}
   0x9   :  { %s162_s21 = scalar_lea.vmem %s19_s13, 512  ;;  %p167_p4 = scmp.lt.s32.totalorder %s19_s13, %s19_s13 }
   0xa   :  { %p163_p3 = scmp.ne.s32.totalorder %s19_s13, %s162_s21  ;;  %p168_p5 = scmp.lt.s32.totalorder %s162_s21, %s162_s21 }
   0xc   :  { %p169_p6 = por %p168_p5, %p167_p4 }
   0xe   :  { %p170_p7 = pnand %p169_p6, %p163_p3 }
  0x10   :  { %173 = shalt.err (!%p170_p7)
}
  0x11   :  { %s225_s22 = smov 128   ;;  %s226_s23 = smov 8  }
  0x12   :  { %24 = dma.hbm_to_vmem [thread:$0]  %s305_s1, 512, %s19_s13, [#allocation5], %s225_s22, %s225_s22, %s226_s23  }
  0x13   :  { %218 = dma.done.wait [#allocation5], 512  }
  0x14   :  { %219 = vsyncadd [#allocation5], 4294966784  ;;  %v30_v0 = vlaneseq  ;;  %s52_s28 = smul.u32 2654435769, %s304_s0  ;;  %v94_v37 = vld [vmem:[#allocation4] sm:$0xff]  ;;  %v95_v43 = vld [vmem:[#allocation4 + $0x8] sm:$0xff] }
  0x15   :  { %v96_v44 = vld [vmem:[#allocation4 + $0x10] sm:$0xff]  ;;  %v98_v45 = vmul.f32 2.0, %v94_v37  ;;  %v97_v48 = vld [vmem:[#allocation4 + $0x18] sm:$0xff]  ;;  %v99_v51 = vmul.f32 2.0, %v95_v43  ;;  %s227_s0 = smov [#allocation7]   ;;  %s228_s29 = smov [#allocation8]  }
  0x16   :  { %v31_v1 = vshrl.u32 %v30_v0, 7  ;;  %v36_v2 = vand.u32 127, %v30_v0  ;;  %v53_v7 = vstv %s52_s28  ;;  %v100_v55 = vmul.f32 2.0, %v96_v44  ;;  %s120_s1 = sshll.u32 %s227_s0, 4  ;;  %s133_s30 = sshll.u32 %s228_s29, 4  ;;  %s121_s1 = int_to_ptr.vmem [resolvable:$true] %s120_s1  ;;  %s270_s30 = int_to_ptr.vmem [resolvable:$true] %s133_s30 }
  0x17   :  { %v101_v56 = vmul.f32 2.0, %v97_v48  ;;  %v229_v63 = vmov 0   ;;  %s174_s4 = scalar_lea.vmem %s121_s1, 512  ;;  %p179_p9 = scmp.lt.s32.totalorder %s121_s1, %s121_s1 }
  0x18   :  { %v43_v3 = vmul.u32 128, %v31_v1  ;;  %v32_v4 = vadd.s32 8, %v31_v1  ;;  %v33_v5 = vadd.s32 16, %v31_v1  ;;  %v34_v6 = vadd.s32 24, %v31_v1  ;;  %p175_p8 = scmp.ne.s32.totalorder %s121_s1, %s174_s4  ;;  %p180_p10 = scmp.lt.s32.totalorder %s174_s4, %s174_s4 }
  0x1a   :  { %v47_v8 = vadd.s32 %v43_v3, %v36_v2  ;;  %v44_v9 = vmul.u32 128, %v32_v4  ;;  %v45_v10 = vmul.u32 128, %v33_v5  ;;  %p181_p11 = por %p180_p10, %p179_p9 }
  0x1b   :  { %v46_v11 = vmul.u32 128, %v34_v6 }
  0x1c   :  { %v54_v12 = vxor.u32 %v53_v7, %v47_v8  ;;  %v48_v13 = vadd.s32 %v44_v9, %v36_v2  ;;  %v49_v14 = vadd.s32 %v45_v10, %v36_v2  ;;  %p182_p12 = pnand %p181_p11, %p175_p8 }
  0x1d   :  { %v50_v15 = vadd.s32 %v46_v11, %v36_v2 }
  0x1e   :  { %v58_v16 = vshrl.u32 %v54_v12, 16  ;;  %v55_v17 = vxor.u32 %v53_v7, %v48_v13  ;;  %v56_v18 = vxor.u32 %v53_v7, %v49_v14 }
  0x1f   :  { %v57_v19 = vxor.u32 %v53_v7, %v50_v15 }
  0x20   :  { %v62_v20 = vxor.u32 %v58_v16, %v54_v12  ;;  %v59_v21 = vshrl.u32 %v55_v17, 16  ;;  %v60_v22 = vshrl.u32 %v56_v18, 16 }
  0x21   :  { %v61_v23 = vshrl.u32 %v57_v19, 16 }
  0x22   :  { %v66_v24 = vmul.u32 2146121005, %v62_v20  ;;  %v63_v25 = vxor.u32 %v59_v21, %v55_v17  ;;  %v64_v26 = vxor.u32 %v60_v22, %v56_v18 }
  0x23   :  { %v65_v27 = vxor.u32 %v61_v23, %v57_v19 }
  0x24   :  { %v70_v28 = vshrl.u32 %v66_v24, 15  ;;  %v67_v29 = vmul.u32 2146121005, %v63_v25  ;;  %v68_v30 = vmul.u32 2146121005, %v64_v26 }
  0x25   :  { %v69_v31 = vmul.u32 2146121005, %v65_v27 }
  0x26   :  { %v74_v32 = vxor.u32 %v70_v28, %v66_v24  ;;  %v71_v33 = vshrl.u32 %v67_v29, 15  ;;  %v72_v34 = vshrl.u32 %v68_v30, 15 }
  0x27   :  { %v73_v35 = vshrl.u32 %v69_v31, 15 }
  0x28   :  { %v78_v36 = vmul.u32 2221713035, %v74_v32  ;;  %v75_v38 = vxor.u32 %v71_v33, %v67_v29  ;;  %v76_v39 = vxor.u32 %v72_v34, %v68_v30 }
  0x29   :  { %v77_v40 = vxor.u32 %v73_v35, %v69_v31 }
  0x2a   :  { %v82_v41 = vshrl.u32 %v78_v36, 16  ;;  %v79_v42 = vmul.u32 2221713035, %v75_v38  ;;  %v80_v46 = vmul.u32 2221713035, %v76_v39 }
  0x2b   :  { %v81_v47 = vmul.u32 2221713035, %v77_v40 }
  0x2c   :  { %v86_v49 = vxor.u32 %v82_v41, %v78_v36  ;;  %v83_v50 = vshrl.u32 %v79_v42, 16  ;;  %v84_v52 = vshrl.u32 %v80_v46, 16 }
  0x2d   :  { %v85_v53 = vshrl.u32 %v81_v47, 16 }
  0x2e   :  { %vm90_vm0 = vcmp.lt.u32.totalorder %v86_v49, 2147483648  ;;  %v87_v54 = vxor.u32 %v83_v50, %v79_v42  ;;  %v88_v58 = vxor.u32 %v84_v52, %v80_v46 }
  0x2f   :  { %v102_v57 = vsel %vm90_vm0, %v98_v45, 0.0  ;;  %v89_v59 = vxor.u32 %v85_v53, %v81_v47 }
  0x30   :  { %106 = vst [vmem:[#allocation7] sm:$0xff] %v102_v57  ;;  %vm91_vm1 = vcmp.lt.u32.totalorder %v87_v54, 2147483648  ;;  %vm92_vm2 = vcmp.lt.u32.totalorder %v88_v58, 2147483648 }
  0x31   :  { %v103_v60 = vsel %vm91_vm1, %v99_v51, 0.0  ;;  %vm93_vm3 = vcmp.lt.u32.totalorder %v89_v59, 2147483648  ;;  %vm110_vm4 = vmpackc.low %vm91_vm1, %vm90_vm0  ;;  %v104_v61 = vsel %vm92_vm2, %v100_v55, 0.0 }
  0x32   :  { %107 = vst [vmem:[#allocation7 + $0x8] sm:$0xff] %v103_v60  ;;  %v105_v62 = vsel %vm93_vm3, %v101_v56, 0.0  ;;  %vm111_vm5 = vmpackc.low %vm93_vm3, %vm92_vm2 }
  0x33   :  { %108 = vst [vmem:[#allocation7 + $0x10] sm:$0xff] %v104_v61  ;;  %109 = vst [vmem:[#allocation7 + $0x18] sm:$0xff] %v105_v62 }
  0x34   :  { %vm112_vm6 = vmpackc.even %vm111_vm5, %vm110_vm4 }
  0x35   :  { %v113_v0 = vsel %vm112_vm6, 16843009, %v229_v63 }
  0x36   :  { %185 = shalt.err (!%p182_p12)
}
  0x37   :  { %s186_s7 = scalar_lea.hbm %s306_s2, 512 }
  0x38   :  { %p187_p13 = scmp.ne.s32.totalorder %s306_s2, %s186_s7  ;;  %p190_p0 = scmp.lt.u32.totalorder %s186_s7, %s306_s2 }
  0x3a   :  { %p192_p1 = pnand %p190_p0, %p187_p13 }
  0x3c   :  { %195 = shalt.err (!%p192_p1)
}
  0x3d   :  { %126 = dma.vmem_to_hbm [thread:$0]  %s121_s1, 512, %s306_s2, [#allocation6], %s225_s22, %s225_s22, %s226_s23   ;;  %114 = vst [vmem:[#allocation8] sm:$0xff] %v113_v0 }
  0x3e   :  { %s196_s14 = scalar_lea.vmem %s270_s30, 128  ;;  %p201_p3 = scmp.lt.s32.totalorder %s270_s30, %s270_s30 }
  0x3f   :  { %p197_p2 = scmp.ne.s32.totalorder %s270_s30, %s196_s14  ;;  %p202_p4 = scmp.lt.s32.totalorder %s196_s14, %s196_s14 }
  0x41   :  { %p203_p5 = por %p202_p4, %p201_p3 }
  0x43   :  { %p204_p6 = pnand %p203_p5, %p197_p2 }
  0x45   :  { %207 = shalt.err (!%p204_p6)
}
  0x46   :  { %s208_s17 = scalar_lea.hbm %s307_s3, 128 }
  0x47   :  { %p209_p7 = scmp.ne.s32.totalorder %s307_s3, %s208_s17  ;;  %p212_p8 = scmp.lt.u32.totalorder %s208_s17, %s307_s3 }
  0x49   :  { %p214_p9 = pnand %p212_p8, %p209_p7 }
  0x4b   :  { %217 = shalt.err (!%p214_p9)
}
  0x4c   :  { %136 = dma.vmem_to_hbm [thread:$0]  %s270_s30, 128, %s307_s3, [#allocation9]  }
  0x4d   :  { %220 = dma.done.wait [#allocation6], 512  }
  0x4e   :  { %221 = vsyncadd [#allocation6], 4294966784 }
  0x4f   :  { %222 = dma.done.wait [#allocation9], 128  }
  0x50   :  { %223 = vsyncadd [#allocation9], 4294967168 }
  0x51   :  { %143 = vsyncpa [#allocation5], 1 }
  0x52   :  { %144 = vsyncpa [#allocation6], 1 }
  0x53   :  { %145 = vsyncpa [#allocation9], 1 }

</bundles_post_ra>
